<compile_context>
chip_gen: v7x
topology: tpu7x:2x2x1
jax: 0.10.0
libtpu: 0.0.40
codegen_flags: <defaults>
</compile_context>

<pallas_src>
import functools

import jax
import jax.numpy as jnp
from jax import lax
from jax.experimental import pallas as pl
from jax.experimental.pallas import tpu as pltpu

BN_EPS = 1e-5
LEAKY_SLOPE = 0.1
# Per grid step we only hold a few hundred KiB; 48 MiB cap leaves headroom on v7x (64 MiB/TC)
# while being far above what double-buffering needs on v5e/v6e.
VMEM_LIMIT_BYTES = 48 * 1024 * 1024


def _conv_tile(xm_ref, xe_ref, w_ref, xf_ref, *, th, wout):
    """Raw conv output for one row tile: (th*wout, Cout) f32.

    xm_ref: (1, th, Wq, 4*Cin) bf16   -- pipelined main input rows for this tile
    xe_ref: (1, 1, Wq, 4*Cin)  bf16   -- one-row halo (row th of the window)
    w_ref : (4, 4*Cin, Cout)   bf16   -- 2x2-phase repacked 3x3 weights
    xf_ref: (th+1, Wq, 4*Cin)  bf16   -- VMEM scratch, halo-assembled window
    """
    # Assemble the (th+1)-row window: rows [0, th) from the main block, row th = halo.
    xf_ref[0:th] = xm_ref[0]
    xf_ref[th] = xe_ref[0, 0]

    cout = w_ref.shape[-1]
    acc = jnp.zeros((th * wout, cout), jnp.float32)
    # 3x3 stride-2 conv == 2x2 stride-1 conv over the space-to-depth input: 4 shifted-slice
    # matmuls, each contracting over 4*Cin, accumulated in f32 (MXU).
    for di in range(2):
        for dj in range(2):
            tap = xf_ref[di:di + th, dj:dj + wout, :]          # (th, wout, 4*Cin) bf16
            tap2d = tap.reshape(th * wout, tap.shape[-1])
            acc = acc + jnp.dot(tap2d, w_ref[di * 2 + dj],
                                preferred_element_type=jnp.float32)
    return acc


# ---------------- pass 1: conv + per-image partial sum / sum-of-squares ----------------
def _stats_kernel(xm_ref, xe_ref, w_ref, sum_ref, ssq_ref, xf_ref, *, th, wout):
    y = _conv_tile(xm_ref, xe_ref, w_ref, xf_ref, th=th, wout=wout)   # (th*wout, Cout) f32

    @pl.when(pl.program_id(1) == 0)          # first row-tile of this image
    def _():
        sum_ref[...] = jnp.zeros_like(sum_ref)
        ssq_ref[...] = jnp.zeros_like(ssq_ref)

    sum_ref[...] += jnp.sum(y, axis=0, keepdims=True)[None]
    ssq_ref[...] += jnp.sum(y * y, axis=0, keepdims=True)[None]


# ---------------- pass 2: conv + folded BN affine + LeakyReLU (channel-dense store) ----
def _bn_act_kernel(xm_ref, xe_ref, w_ref, scale_ref, bias_ref, o_ref, xf_ref, *, th, wout):
    y = _conv_tile(xm_ref, xe_ref, w_ref, xf_ref, th=th, wout=wout)   # (th*wout, Cout) f32
    z = y * scale_ref[...] + bias_ref[...]                             # folded BN: one FMA
    z = jnp.where(z >= 0, z, LEAKY_SLOPE * z)
    o_ref[...] = z.reshape(o_ref.shape)                                # (1, th, wout, Cout)


def _pick_row_tile(hout, wout, target_rows):
    th = 1
    for d in range(1, hout + 1):
        if hout % d == 0 and d * wout <= target_rows:
            th = d
    return th


def downsampling_layer(x_nchw, w_oihw, gamma, beta, *, target_rows=2048):
    """x_nchw: (N, Cin, H, W) f32; w_oihw: (Cout, Cin, 3, 3); gamma/beta: (Cout,)."""
    N, Cin, H, W = x_nchw.shape
    Cout = w_oihw.shape[0]
    Hout = (H - 1) // 2 + 1
    Wout = (W - 1) // 2 + 1
    Hq, Wq = Hout + 1, Wout + 1              # space-to-depth spatial extents
    C4 = 4 * Cin

    # ---- wrapper layout plumbing (no data amplification): pad + space-to-depth + bf16 ----
    x_nhwc = jnp.transpose(x_nchw, (0, 2, 3, 1))
    pad_b = 2 * Hq - 1 - H                   # 1 (even H) or 2 (odd H); extra row is unused
    pad_r = 2 * Wq - 1 - W
    xp = jnp.pad(x_nhwc, ((0, 0), (1, pad_b), (1, pad_r), (0, 0)))
    # channel order = (dr*2 + dc)*Cin + c, matching the weight repack below
    xs = (xp.reshape(N, Hq, 2, Wq, 2, Cin)
            .transpose(0, 1, 3, 2, 4, 5)
            .reshape(N, Hq, Wq, C4)
            .astype(jnp.bfloat16))

    # ---- repack 3x3 weights into 2x2 phase taps: (4, 4*Cin, Cout) ----
    w_hwio = jnp.transpose(w_oihw, (2, 3, 1, 0)).astype(jnp.float32)   # (3,3,Cin,Cout)
    taps = []
    for di in range(2):
        for dj in range(2):
            rows = []
            for dr in range(2):
                for dc in range(2):
                    kh, kw = 2 * di + dr, 2 * dj + dc
                    if kh < 3 and kw < 3:
                        rows.append(w_hwio[kh, kw])
                    else:
                        rows.append(jnp.zeros((Cin, Cout), jnp.float32))
            taps.append(jnp.concatenate(rows, axis=0))                 # (4*Cin, Cout)
    w2 = jnp.stack(taps, axis=0).astype(jnp.bfloat16)                  # (4, 4*Cin, Cout)

    # ---- row tiling: TH output rows per grid step (TH | Hout) ----
    th = _pick_row_tile(Hout, Wout, target_rows)
    R = Hout // th
    TM = th * Wout

    xs_main_spec = pl.BlockSpec((1, th, Wq, C4), lambda n, r: (n, r, 0, 0))
    # one-row halo: row (r+1)*th of the same array (block size 1 -> element index)
    xs_halo_spec = pl.BlockSpec((1, 1, Wq, C4), lambda n, r: (n, (r + 1) * th, 0, 0))
    w_spec = pl.BlockSpec((4, C4, Cout), lambda n, r: (0, 0, 0))

    # ---- pass 1: batch statistics (per-image partials -> batch axis is parallel) ----
    kern1 = functools.partial(_stats_kernel, th=th, wout=Wout)
    sum_part, ssq_part = pl.pallas_call(
        kern1,
        out_shape=(jax.ShapeDtypeStruct((N, 1, Cout), jnp.float32),
                   jax.ShapeDtypeStruct((N, 1, Cout), jnp.float32)),
        grid_spec=pltpu.PrefetchScalarGridSpec(
            num_scalar_prefetch=0,
            grid=(N, R),
            in_specs=[xs_main_spec, xs_halo_spec, w_spec],
            out_specs=[pl.BlockSpec((1, 1, Cout), lambda n, r: (n, 0, 0)),
                       pl.BlockSpec((1, 1, Cout), lambda n, r: (n, 0, 0))],
            scratch_shapes=[pltpu.VMEM((th + 1, Wq, C4), jnp.bfloat16)],
        ),
        compiler_params=pltpu.CompilerParams(
            dimension_semantics=("parallel", "arbitrary"),
            vmem_limit_bytes=VMEM_LIMIT_BYTES,
        ),
        cost_estimate=pl.CostEstimate(
            flops=int(2 * N * Hout * Wout * 4 * C4 * Cout),
            transcendentals=0,
            bytes_accessed=int(xs.size * 2 + w2.size * 2 + 2 * N * Cout * 4),
        ),
    )(xs, xs, w2)

    # ---- fold BN (biased batch stats over N,Hout,Wout) + affine into scale/bias ----
    m_total = jnp.float32(N * Hout * Wout)
    sum_c = jnp.sum(sum_part, axis=0)        # (1, Cout) f32
    ssq_c = jnp.sum(ssq_part, axis=0)
    mean = sum_c / m_total
    # NOTE: E[x^2]-E[x]^2 in f32 can cancel when |mean| >> std (flagged in review); a
    # Welford / shifted formulation would need an extra pass over the data.
    var = jnp.maximum(ssq_c / m_total - mean * mean, 0.0)
    inv_std = lax.rsqrt(var + BN_EPS)
    scale = gamma.astype(jnp.float32).reshape(1, Cout) * inv_std
    bias = beta.astype(jnp.float32).reshape(1, Cout) - mean * scale

    # ---- pass 2: recompute conv + normalize + activate (fully parallel grid) ----
    kern2 = functools.partial(_bn_act_kernel, th=th, wout=Wout)
    out_nhwc = pl.pallas_call(
        kern2,
        out_shape=jax.ShapeDtypeStruct((N, Hout, Wout, Cout), jnp.float32),
        grid_spec=pltpu.PrefetchScalarGridSpec(
            num_scalar_prefetch=0,
            grid=(N, R),
            in_specs=[xs_main_spec, xs_halo_spec, w_spec,
                      pl.BlockSpec((1, Cout), lambda n, r: (0, 0)),
                      pl.BlockSpec((1, Cout), lambda n, r: (0, 0))],
            out_specs=pl.BlockSpec((1, th, Wout, Cout), lambda n, r: (n, r, 0, 0)),
            scratch_shapes=[pltpu.VMEM((th + 1, Wq, C4), jnp.bfloat16)],
        ),
        compiler_params=pltpu.CompilerParams(
            dimension_semantics=("parallel", "parallel"),
            vmem_limit_bytes=VMEM_LIMIT_BYTES,
        ),
        cost_estimate=pl.CostEstimate(
            flops=int(2 * N * Hout * Wout * 4 * C4 * Cout + 3 * N * Hout * Wout * Cout),
            transcendentals=0,
            bytes_accessed=int(xs.size * 2 + w2.size * 2 + 2 * Cout * 4
                               + N * Hout * Wout * Cout * 4),
        ),
    )(xs, xs, w2, scale, bias)

    # channel-dense NHWC result; single transpose back to NCHW (module semantics)
    return jnp.transpose(out_nhwc, (0, 3, 1, 2))


def _reference(x_nchw, w_oihw, gamma, beta):
    y = lax.conv_general_dilated(
        x_nchw, w_oihw, window_strides=(2, 2), padding=((1, 1), (1, 1)),
        dimension_numbers=("NCHW", "OIHW", "NCHW"))
    mean = y.mean(axis=(0, 2, 3), keepdims=True)
    var = ((y - mean) ** 2).mean(axis=(0, 2, 3), keepdims=True)
    y_hat = (y - mean) / jnp.sqrt(var + BN_EPS)
    z = gamma.reshape(1, -1, 1, 1) * y_hat + beta.reshape(1, -1, 1, 1)
    return jnp.where(z >= 0, z, LEAKY_SLOPE * z)


if __name__ == "__main__":
    key = jax.random.PRNGKey(0)
    k_x, k_w, k_g, k_b = jax.random.split(key, 4)

    N, Cin, H, W = 2, 4, 16, 16
    Cout = 8

    x = jax.random.normal(k_x, (N, Cin, H, W), dtype=jnp.float32)
    w = jax.random.normal(k_w, (Cout, Cin, 3, 3), dtype=jnp.float32) * 0.1
    gamma = 1.0 + 0.1 * jax.random.normal(k_g, (Cout,), dtype=jnp.float32)
    beta = 0.1 * jax.random.normal(k_b, (Cout,), dtype=jnp.float32)

    out = downsampling_layer(x, w, gamma, beta)
    out = jax.block_until_ready(out)
    assert out.shape == (N, Cout, H // 2, W // 2), out.shape

    # Strict check vs a reference whose conv operands are quantized to bf16 exactly like the
    # kernel's MXU operands (validates the conv/BN/affine/LeakyReLU math tightly).
    xq = x.astype(jnp.bfloat16).astype(jnp.float32)
    wq = w.astype(jnp.bfloat16).astype(jnp.float32)
    ref_q = _reference(xq, wq, gamma, beta)
    assert jnp.allclose(out, ref_q, rtol=1e-3, atol=1e-3), float(jnp.max(jnp.abs(out - ref_q)))

    # Looser sanity check vs the full-f32 reference (difference = intentional bf16 rounding
    # of the matmul operands).
    ref = _reference(x, w, gamma, beta)
    assert jnp.allclose(out, ref, rtol=5e-2, atol=5e-2), float(jnp.max(jnp.abs(out - ref)))

    print("KERNEL_OK")
</pallas_src>

<mosaic_0001>
module attributes {stable_mosaic.version = 11 : i64} {
  func.func @_stats_kernel(%arg0: i32, %arg1: i32, %arg2: memref<1x8x9x16xbf16, #tpu.memory_space<vmem>>, %arg3: memref<1x1x9x16xbf16, #tpu.memory_space<vmem>>, %arg4: memref<4x16x8xbf16, #tpu.memory_space<vmem>>, %arg5: memref<1x1x8xf32, #tpu.memory_space<vmem>>, %arg6: memref<1x1x8xf32, #tpu.memory_space<vmem>>, %arg7: memref<9x9x16xbf16, #tpu.memory_space<vmem>>) attributes {dimension_semantics = [#tpu.dimension_semantics<parallel>, #tpu.dimension_semantics<arbitrary>], iteration_bounds = array<i64: 2, 1>, scalar_prefetch = 0 : i64, scratch_operands = 1 : i64, tpu.core_type = #tpu.core_type<tc>, window_params = [{transform_indices = @transform_0, window_bounds = array<i64: 1, 8, 9, 16>}, {transform_indices = @transform_1, window_bounds = array<i64: 1, 1, 9, 16>}, {pipeline_mode = #tpu.pipeline_mode<synchronous>, transform_indices = @transform_2, window_bounds = array<i64: 4, 16, 8>}, {transform_indices = @transform_3, window_bounds = array<i64: 1, 1, 8>}, {transform_indices = @transform_4, window_bounds = array<i64: 1, 1, 8>}]} {
    %c0 = arith.constant 0 : index
    %c0_0 = arith.constant 0 : index
    %c0_1 = arith.constant 0 : index
    %c0_2 = arith.constant 0 : index
    %0 = vector.load %arg2[%c0, %c0_0, %c0_1, %c0_2] : memref<1x8x9x16xbf16, #tpu.memory_space<vmem>>, vector<1x8x9x16xbf16>
    %1 = vector.shape_cast %0 : vector<1x8x9x16xbf16> to vector<8x9x16xbf16>
    %c0_3 = arith.constant 0 : index
    %c0_4 = arith.constant 0 : index
    %c0_5 = arith.constant 0 : index
    %2 = vector.load %arg7[%c0_3, %c0_4, %c0_5] : memref<9x9x16xbf16, #tpu.memory_space<vmem>>, vector<8x9x16xbf16>
    tpu.vector_store %arg7[%c0_3, %c0_4, %c0_5], %1 {strides = array<i32>} : memref<9x9x16xbf16, #tpu.memory_space<vmem>>, vector<8x9x16xbf16>,
    %c0_6 = arith.constant 0 : index
    %c0_7 = arith.constant 0 : index
    %c0_8 = arith.constant 0 : index
    %c0_9 = arith.constant 0 : index
    %3 = vector.load %arg3[%c0_6, %c0_7, %c0_8, %c0_9] : memref<1x1x9x16xbf16, #tpu.memory_space<vmem>>, vector<1x1x9x16xbf16>
    %4 = vector.shape_cast %3 : vector<1x1x9x16xbf16> to vector<9x16xbf16>
    %c8 = arith.constant 8 : index
    %c0_10 = arith.constant 0 : index
    %c0_11 = arith.constant 0 : index
    %5 = vector.load %arg7[%c8, %c0_10, %c0_11] : memref<9x9x16xbf16, #tpu.memory_space<vmem>>, vector<1x9x16xbf16>
    %6 = vector.shape_cast %5 : vector<1x9x16xbf16> to vector<9x16xbf16>
    %7 = vector.shape_cast %4 : vector<9x16xbf16> to vector<1x9x16xbf16>
    tpu.vector_store %arg7[%c8, %c0_10, %c0_11], %7 {strides = array<i32>} : memref<9x9x16xbf16, #tpu.memory_space<vmem>>, vector<1x9x16xbf16>,
    %cst = arith.constant 0.000000e+00 : f32
    %8 = vector.broadcast %cst : f32 to vector<64x8xf32>
    %c0_12 = arith.constant 0 : index
    %c0_13 = arith.constant 0 : index
    %c0_14 = arith.constant 0 : index
    %9 = vector.load %arg7[%c0_12, %c0_13, %c0_14] : memref<9x9x16xbf16, #tpu.memory_space<vmem>>, vector<8x8x16xbf16>
    %10 = vector.shape_cast %9 : vector<8x8x16xbf16> to vector<64x16xbf16>
    %c0_15 = arith.constant 0 : index
    %c0_16 = arith.constant 0 : index
    %c0_17 = arith.constant 0 : index
    %11 = vector.load %arg4[%c0_15, %c0_16, %c0_17] : memref<4x16x8xbf16, #tpu.memory_space<vmem>>, vector<1x16x8xbf16>
    %12 = vector.shape_cast %11 : vector<1x16x8xbf16> to vector<16x8xbf16>
    %cst_18 = arith.constant dense<0.000000e+00> : vector<64x8xf32>
    %13 = tpu.matmul %10, %12, %cst_18 {dimension_numbers = #tpu.dot_dimension_numbers<[1], [0], [0], [1], [0, 0, 1, 1], [], []>} : vector<64x16xbf16>, vector<16x8xbf16>, vector<64x8xf32> -> vector<64x8xf32>
    %14 = arith.addf %8, %13 : vector<64x8xf32>
    %c0_19 = arith.constant 0 : index
    %c1 = arith.constant 1 : index
    %c0_20 = arith.constant 0 : index
    %15 = vector.load %arg7[%c0_19, %c1, %c0_20] : memref<9x9x16xbf16, #tpu.memory_space<vmem>>, vector<8x8x16xbf16>
    %16 = vector.shape_cast %15 : vector<8x8x16xbf16> to vector<64x16xbf16>
    %c1_21 = arith.constant 1 : index
    %c0_22 = arith.constant 0 : index
    %c0_23 = arith.constant 0 : index
    %17 = vector.load %arg4[%c1_21, %c0_22, %c0_23] : memref<4x16x8xbf16, #tpu.memory_space<vmem>>, vector<1x16x8xbf16>
    %18 = vector.shape_cast %17 : vector<1x16x8xbf16> to vector<16x8xbf16>
    %cst_24 = arith.constant dense<0.000000e+00> : vector<64x8xf32>
    %19 = tpu.matmul %16, %18, %cst_24 {dimension_numbers = #tpu.dot_dimension_numbers<[1], [0], [0], [1], [0, 0, 1, 1], [], []>} : vector<64x16xbf16>, vector<16x8xbf16>, vector<64x8xf32> -> vector<64x8xf32>
    %20 = arith.addf %14, %19 : vector<64x8xf32>
    %c1_25 = arith.constant 1 : index
    %c0_26 = arith.constant 0 : index
    %c0_27 = arith.constant 0 : index
    %21 = vector.load %arg7[%c1_25, %c0_26, %c0_27] : memref<9x9x16xbf16, #tpu.memory_space<vmem>>, vector<8x8x16xbf16>
    %22 = vector.shape_cast %21 : vector<8x8x16xbf16> to vector<64x16xbf16>
    %c2 = arith.constant 2 : index
    %c0_28 = arith.constant 0 : index
    %c0_29 = arith.constant 0 : index
    %23 = vector.load %arg4[%c2, %c0_28, %c0_29] : memref<4x16x8xbf16, #tpu.memory_space<vmem>>, vector<1x16x8xbf16>
    %24 = vector.shape_cast %23 : vector<1x16x8xbf16> to vector<16x8xbf16>
    %cst_30 = arith.constant dense<0.000000e+00> : vector<64x8xf32>
    %25 = tpu.matmul %22, %24, %cst_30 {dimension_numbers = #tpu.dot_dimension_numbers<[1], [0], [0], [1], [0, 0, 1, 1], [], []>} : vector<64x16xbf16>, vector<16x8xbf16>, vector<64x8xf32> -> vector<64x8xf32>
    %26 = arith.addf %20, %25 : vector<64x8xf32>
    %c1_31 = arith.constant 1 : index
    %c1_32 = arith.constant 1 : index
    %c0_33 = arith.constant 0 : index
    %27 = vector.load %arg7[%c1_31, %c1_32, %c0_33] : memref<9x9x16xbf16, #tpu.memory_space<vmem>>, vector<8x8x16xbf16>
    %28 = vector.shape_cast %27 : vector<8x8x16xbf16> to vector<64x16xbf16>
    %c3 = arith.constant 3 : index
    %c0_34 = arith.constant 0 : index
    %c0_35 = arith.constant 0 : index
    %29 = vector.load %arg4[%c3, %c0_34, %c0_35] : memref<4x16x8xbf16, #tpu.memory_space<vmem>>, vector<1x16x8xbf16>
    %30 = vector.shape_cast %29 : vector<1x16x8xbf16> to vector<16x8xbf16>
    %cst_36 = arith.constant dense<0.000000e+00> : vector<64x8xf32>
    %31 = tpu.matmul %28, %30, %cst_36 {dimension_numbers = #tpu.dot_dimension_numbers<[1], [0], [0], [1], [0, 0, 1, 1], [], []>} : vector<64x16xbf16>, vector<16x8xbf16>, vector<64x8xf32> -> vector<64x8xf32>
    %32 = arith.addf %26, %31 : vector<64x8xf32>
    %c0_i32 = arith.constant 0 : i32
    %33 = arith.cmpi eq, %arg1, %c0_i32 : i32
    %34 = arith.extui %33 : i1 to i32
    %c0_i32_37 = arith.constant 0 : i32
    %35 = arith.cmpi ne, %34, %c0_i32_37 : i32
    scf.if %35 {
      %cst_52 = arith.constant 0.000000e+00 : f32
      %49 = vector.broadcast %cst_52 : f32 to vector<1x1x8xf32>
      %c0_53 = arith.constant 0 : index
      %c0_54 = arith.constant 0 : index
      %c0_55 = arith.constant 0 : index
      %50 = vector.load %arg5[%c0_53, %c0_54, %c0_55] : memref<1x1x8xf32, #tpu.memory_space<vmem>>, vector<1x1x8xf32>
      tpu.vector_store %arg5[%c0_53, %c0_54, %c0_55], %49 {strides = array<i32>} : memref<1x1x8xf32, #tpu.memory_space<vmem>>, vector<1x1x8xf32>,
      %cst_56 = arith.constant 0.000000e+00 : f32
      %51 = vector.broadcast %cst_56 : f32 to vector<1x1x8xf32>
      %c0_57 = arith.constant 0 : index
      %c0_58 = arith.constant 0 : index
      %c0_59 = arith.constant 0 : index
      %52 = vector.load %arg6[%c0_57, %c0_58, %c0_59] : memref<1x1x8xf32, #tpu.memory_space<vmem>>, vector<1x1x8xf32>
      tpu.vector_store %arg6[%c0_57, %c0_58, %c0_59], %51 {strides = array<i32>} : memref<1x1x8xf32, #tpu.memory_space<vmem>>, vector<1x1x8xf32>,
    } else {
    }
    %c0_38 = arith.constant 0 : index
    %c0_39 = arith.constant 0 : index
    %c0_40 = arith.constant 0 : index
    %36 = vector.load %arg5[%c0_38, %c0_39, %c0_40] : memref<1x1x8xf32, #tpu.memory_space<vmem>>, vector<1x1x8xf32>
    %cst_41 = arith.constant dense<0.000000e+00> : vector<8xf32>
    %37 = vector.multi_reduction <add>, %32, %cst_41 [0] : vector<64x8xf32> to vector<8xf32>
    %38 = vector.shape_cast %37 : vector<8xf32> to vector<1x8xf32>
    %39 = vector.shape_cast %38 : vector<1x8xf32> to vector<1x1x8xf32>
    %40 = arith.addf %36, %39 : vector<1x1x8xf32>
    %c0_42 = arith.constant 0 : index
    %c0_43 = arith.constant 0 : index
    %c0_44 = arith.constant 0 : index
    %41 = vector.load %arg5[%c0_42, %c0_43, %c0_44] : memref<1x1x8xf32, #tpu.memory_space<vmem>>, vector<1x1x8xf32>
    tpu.vector_store %arg5[%c0_42, %c0_43, %c0_44], %40 {strides = array<i32>} : memref<1x1x8xf32, #tpu.memory_space<vmem>>, vector<1x1x8xf32>,
    %c0_45 = arith.constant 0 : index
    %c0_46 = arith.constant 0 : index
    %c0_47 = arith.constant 0 : index
    %42 = vector.load %arg6[%c0_45, %c0_46, %c0_47] : memref<1x1x8xf32, #tpu.memory_space<vmem>>, vector<1x1x8xf32>
    %43 = arith.mulf %32, %32 : vector<64x8xf32>
    %cst_48 = arith.constant dense<0.000000e+00> : vector<8xf32>
    %44 = vector.multi_reduction <add>, %43, %cst_48 [0] : vector<64x8xf32> to vector<8xf32>
    %45 = vector.shape_cast %44 : vector<8xf32> to vector<1x8xf32>
    %46 = vector.shape_cast %45 : vector<1x8xf32> to vector<1x1x8xf32>
    %47 = arith.addf %42, %46 : vector<1x1x8xf32>
    %c0_49 = arith.constant 0 : index
    %c0_50 = arith.constant 0 : index
    %c0_51 = arith.constant 0 : index
    %48 = vector.load %arg6[%c0_49, %c0_50, %c0_51] : memref<1x1x8xf32, #tpu.memory_space<vmem>>, vector<1x1x8xf32>
    tpu.vector_store %arg6[%c0_49, %c0_50, %c0_51], %47 {strides = array<i32>} : memref<1x1x8xf32, #tpu.memory_space<vmem>>, vector<1x1x8xf32>,
    return
  }
  func.func @transform_0(%arg0: i32, %arg1: i32) -> (i32, i32, i32, i32) {
    %c0_i32 = arith.constant 0 : i32
    %c0_i32_0 = arith.constant 0 : i32
    %c0_i32_1 = arith.constant 0 : i32
    return %arg0, %arg1, %c0_i32, %c0_i32_0 : i32, i32, i32, i32
  }
  func.func @transform_1(%arg0: i32, %arg1: i32) -> (i32, i32, i32, i32) {
    %c1_i32 = arith.constant 1 : i32
    %0 = arith.addi %arg1, %c1_i32 : i32
    %c8_i32 = arith.constant 8 : i32
    %1 = arith.muli %0, %c8_i32 : i32
    %c0_i32 = arith.constant 0 : i32
    %c0_i32_0 = arith.constant 0 : i32
    %c0_i32_1 = arith.constant 0 : i32
    return %arg0, %1, %c0_i32, %c0_i32_0 : i32, i32, i32, i32
  }
  func.func @transform_2(%arg0: i32, %arg1: i32) -> (i32, i32, i32) {
    %c0_i32 = arith.constant 0 : i32
    %c0_i32_0 = arith.constant 0 : i32
    %c0_i32_1 = arith.constant 0 : i32
    %c0_i32_2 = arith.constant 0 : i32
    return %c0_i32, %c0_i32_0, %c0_i32_1 : i32, i32, i32
  }
  func.func @transform_3(%arg0: i32, %arg1: i32) -> (i32, i32, i32) {
    %c0_i32 = arith.constant 0 : i32
    %c0_i32_0 = arith.constant 0 : i32
    %c0_i32_1 = arith.constant 0 : i32
    return %arg0, %c0_i32, %c0_i32_0 : i32, i32, i32
  }
  func.func @transform_4(%arg0: i32, %arg1: i32) -> (i32, i32, i32) {
    %c0_i32 = arith.constant 0 : i32
    %c0_i32_0 = arith.constant 0 : i32
    %c0_i32_1 = arith.constant 0 : i32
    return %arg0, %c0_i32, %c0_i32_0 : i32, i32, i32
  }
}

</mosaic_0001>

<bundles_post_ra>
// kernel: tpu_custom_call.1
= control target key start
LH: loop header
LB: loop body
LE: loop exit
PB: predicated region body
PF: predicated region fallthrough
CT: control target
= control target key end

     0   :  { %10 = vsyncpa [#allocation4], 0  ;;  %s1975_s0 = inlined_call_operand.vmem [shape: bf16[2,9,9,16], index: 0, kind: input, shape index: {}]   ;;  %s1976_s1 = inlined_call_operand.vmem [shape: bf16[2,9,9,16], index: 1, kind: input, shape index: {}]   ;;  %s1977_s2 = inlined_call_operand.vmem [shape: bf16[4,16,8], index: 2, kind: input, shape index: {}]   ;;  %s1978_s3 = inlined_call_operand.hbm [shape: f32[2,1,8], index: 3, kind: output, shape index: {0}]   ;;  %s1979_s4 = inlined_call_operand.hbm [shape: f32[2,1,8], index: 4, kind: output, shape index: {1}]  }
   0x1   :  { %12 = vsyncpa [#allocation4 + $0x1], 0 }
   0x2   :  { %13 = vsyncpa [#allocation6], 0 }
   0x3   :  { %15 = vsyncpa [#allocation6 + $0x1], 0  ;;  %s1631_s15 = smov 0   ;;  %s1633_s16 = smov 0  }
   0x4   :  { %s1635_s17 = smov 0   ;;  %s1637_s18 = smov 0  }
   0x5   :  { %s1639_s19 = smov 0   ;;  %s1641_s20 = smov 0  }
   0x6 LB: > { %s1277_s21 = sadd.s32 4294967295, %s1601_s20   ;;  %s1278_s22 = sadd.s32 4294967294, %s1601_s20   ;;  %s1601_s20 = sphi %s1641_s20, %s21_s20   ;;  %s1597_s19 = sphi %s1639_s19, %s1990_s19   ;;  %s1593_s18 = sphi %s1637_s18, %s1989_s18   ;;  %s1589_s17 = sphi %s1635_s17, %s1988_s17   ;;  %s1585_s16 = sphi %s1633_s16, %s1987_s16   ;;  %s1581_s15 = sphi %s1631_s15, %s1986_s15  }
   0x7   : > { %s33_s23 = sadd.s32 1, %s1597_s19  ;;  %s121_s24 = sadd.s32 1, %s1589_s17 }
   0x8   : > { %p35_p0 = scmp.ge.s32.totalorder %s33_s23, 2  ;;  %p131_p1 = scmp.ne.s32.totalorder %s1589_s17, %s1585_s16 }
   0x9   : > { %p132_p2 = scmp.eq.s32.totalorder %s1277_s21, 1  ;;  %p137_p3 = scmp.ne.s32.totalorder %s1585_s16, %s1581_s15 }
   0xa   : > { %s1992_s23 = smov (%p35_p0, %s33_s23), 0  ;;  %p138_p5 = scmp.eq.s32.totalorder %s1278_s22, 1 }
   0xb   : > { %p1671_p4 = por %p132_p2, %p131_p1  ;;  %s118_s26 = ssub.s32 %s1597_s19, %s1992_s23 }
   0xc   : > { %p1281_p6 = scmp.ge.s32.totalorder %s1601_s20, 1  ;;  %p119_p7 = scmp.eq.s32.totalorder %s118_s26, 0 }
   0xd   : > { %p1678_p8 = por %p138_p5, %p137_p3  ;;  %p225_p9 = scmp.lt.s32.totalorder %s1601_s20, 3 }
   0xe   : > { %s1684_s28 = scalar_select %p119_p7, %s1589_s17, %s121_s24  }
   0xf   : > { %p226_p10 = pnand %p1281_p6, %p225_p9 }
  0x10   : > { %v1480_v0 = vld [vmem:[%s1977_s2 + $0x10] sm:$0xff] (!%p226_p10)   ;;  %p281_p11 = scmp.lt.s32.totalorder (!%p226_p10), %s1593_s18, 1  ;;  %v1483_v1 = vld [vmem:[%s1977_s2 + $0x8] sm:$0xff] (!%p226_p10)   ;;  %v1697_v2 = vld [vmem:[%s1977_s2] sm:$0xff] (!%p226_p10)   ;;  %vm328_vm0 = vcmask (!%p226_p10), 122880   ;;  %vm326_vm2 = vcmask (!%p226_p10), 125952  }
  0x11   : > { %229 = sbr.rel (%p226_p10) target bundleno = 371 (0x173), region = 32  ;;  %1372 = vmatprep.subr.bf16.mxu0 (!%p226_p10), %v1480_v0  ;;  %vm329_vm1 = vsmask.f32 (!%p226_p10), 256  ;;  %1352 = vmatprep.subr.bf16.mxu1 (!%p226_p10), %v1483_v1  ;;  %v1702_v3 = vld [vmem:[%s1977_s2 + $0x18] sm:$0xff] (!%p226_p10)   ;;  %v331_v4 = vld [vmem:[#allocation2 + $0x4] sm:$0x1] (!%p226_p10) }
  0x12   : > { %1373 = vmatpush3.bf16.msra.mxu0 (!%p226_p10), %v1480_v0  ;;  %1353 = vmatpush3.bf16.msra.mxu1 (!%p226_p10), %v1483_v1  ;;  %v335_v5 = vld [vmem:[#allocation2 + $0xc] sm:$0x1] (!%p226_p10)  ;;  %vm523_vm3 = vcmask (!%p226_p10), 130048   ;;  %vm1709_vm4 = vmand (!%p226_p10), %vm328_vm0, %vm329_vm1  ;;  %v366_v7 = vld [vmem:[#allocation2 + $0x44] sm:$0x1] (!%p226_p10)  ;;  %s1858_s30 = sand.u32 (!%p226_p10), 1, %s1585_s16  }
  0x13   : > { %1362 = vmatprep.subr.bf16.mxu1 (!%p226_p10), %v1697_v2  ;;  %1382 = vmatprep.subr.bf16.mxu0 (!%p226_p10), %v1702_v3  ;;  %v339_v25 = vld [vmem:[#allocation2 + $0x14] sm:$0x1] (!%p226_p10)  ;;  %v343_v27 = vld [vmem:[#allocation2 + $0x1c] sm:$0x1] (!%p226_p10)  ;;  %vm387_vm5 = vsmask.f32 (!%p226_p10), 3328 }
  0x14   : > { %vm388_vm6 = vsmask.f32 (!%p226_p10), 7440  ;;  %v347_v31 = vld [vmem:[#allocation2 + $0x24] sm:$0x1] (!%p226_p10)  ;;  %v351_v32 = vld [vmem:[#allocation2 + $0x2c] sm:$0x1] (!%p226_p10) }
  0x15   : > { %v355_v37 = vld [vmem:[#allocation2 + $0x34] sm:$0x1] (!%p226_p10)  ;;  %v359_v38 = vld [vmem:[#allocation2 + $0x3c] sm:$0x1] (!%p226_p10)  ;;  %vm1781_vm7 = vmor (!%p226_p10), %vm387_vm5, %vm388_vm6  ;;  %vm1065_vm8 = vcmask (!%p226_p10), 57344   ;;  %s1866_s6 = scalar_lea.vmem (!%p226_p10), [#allocation5], %s1858_s30 }
  0x16   : > { %vm1069_vm9 = vcmask (!%p226_p10), 64512   ;;  %s1326_s7 = sshll.u32 (!%p226_p10), %s1593_s18, 4  ;;  %s1156_s9 = sshll.u32 (!%p226_p10), %s1866_s6, 4  ;;  %s1905_s9 = int_to_ptr.vmem [resolvable:$true] %s1156_s9 }
  0x17   : > { %s1893_s12 = scalar_lea.hbm (!%p226_p10), %s1978_s3, %s1326_s7  ;;  %s1903_s14 = scalar_lea.hbm (!%p226_p10), %s1979_s4, %s1326_s7 }
  0x18   : > { %s282_s5 = scalar_select %p281_p11, %s1593_s18, 1 }
  0x19   : > { %s1604_s24 = smov [#allocation3]  }
  0x1a   : > { %s1416_s10 = smul.u32 72, %s282_s5  ;;  %s1861_s5 = scalar_lea.vmem [#allocation3], %s1858_s30 }
  0x1b   : > { %s1143_s8 = sshll.u32 %s1861_s5, 4  ;;  %s1495_s26 = sshll.u32 %s1604_s24, 4  ;;  %s1895_s8 = int_to_ptr.vmem [resolvable:$true] %s1143_s8  ;;  %s1496_s26 = int_to_ptr.vmem [resolvable:$false] %s1495_s26 }
  0x1c   : > { %s1707_s21 = scalar_lea.vmem %s1975_s0, %s1416_s10  ;;  %s1331_s22 = sadd.s32 64, %s1416_s10 }
  0x1d   : > { %v312_v8 = vld [vmem:[%s1707_s21 + $0x8] sm:$0xf]  ;;  %v314_v9 = vld [vmem:[%s1707_s21 + $0x10] sm:$0xf]  ;;  %v316_v10 = vld [vmem:[%s1707_s21 + $0x18] sm:$0xf]  ;;  %s306_s29 = scalar_lea.vmem %s1976_s1, %s1331_s22  ;;  %p1498_p1 = scmp.lt.s32.totalorder %s1895_s8, %s1496_s26 }
  0x1e   : > { %334 = vst.msk [vmem:[#allocation2 + $0x8] sm:$0xf] %vm326_vm2, %v312_v8  ;;  %338 = vst.msk [vmem:[#allocation2 + $0x10] sm:$0xf] %vm326_vm2, %v314_v9  ;;  %v318_v11 = vld [vmem:[%s1707_s21 + $0x20] sm:$0xf] }
  0x1f   : > { %342 = vst.msk [vmem:[#allocation2 + $0x18] sm:$0xf] %vm326_vm2, %v316_v10  ;;  %v320_v12 = vld [vmem:[%s1707_s21 + $0x28] sm:$0xf]  ;;  %v322_v13 = vld [vmem:[%s1707_s21 + $0x30] sm:$0xf] }
  0x20   : > { %346 = vst.msk [vmem:[#allocation2 + $0x20] sm:$0xf] %vm326_vm2, %v318_v11  ;;  %350 = vst.msk [vmem:[#allocation2 + $0x28] sm:$0xf] %vm326_vm2, %v320_v12  ;;  %v310_v14 = vld [vmem:[%s1707_s21] sm:$0xf] }
  0x21   : > { %354 = vst.msk [vmem:[#allocation2 + $0x30] sm:$0xf] %vm326_vm2, %v322_v13  ;;  %v311_v15 = vld [vmem:[%s1707_s21 + $0x4] sm:$0x1]  ;;  %v313_v16 = vld [vmem:[%s1707_s21 + $0xc] sm:$0x1] }
  0x22   : > { %327 = vst.msk [vmem:[#allocation2] sm:$0xf] %vm326_vm2, %v310_v14  ;;  %v332_v17 = vsel %vm1709_vm4, %v311_v15, %v331_v4  ;;  %v336_v18 = vsel %vm1709_vm4, %v313_v16, %v335_v5  ;;  %v324_v19 = vld [vmem:[%s1707_s21 + $0x38] sm:$0xf]  ;;  %v362_v20 = vld [vmem:[%s306_s29] sm:$0xf] }
  0x23   : > { %v363_v21 = vld [vmem:[%s306_s29 + $0x4] sm:$0x1]  ;;  %333 = vst [vmem:[#allocation2 + $0x4] sm:$0x1] %v332_v17  ;;  %337 = vst [vmem:[#allocation2 + $0xc] sm:$0x1] %v336_v18 }
  0x24   : > { %358 = vst.msk [vmem:[#allocation2 + $0x38] sm:$0xf] %vm326_vm2, %v324_v19  ;;  %365 = vst.msk [vmem:[#allocation2 + $0x40] sm:$0xf] %vm326_vm2, %v362_v20  ;;  %v367_v22 = vsel %vm1709_vm4, %v363_v21, %v366_v7  ;;  %v315_v23 = vld [vmem:[%s1707_s21 + $0x14] sm:$0x1] }
  0x25   : > { %v317_v24 = vld [vmem:[%s1707_s21 + $0x1c] sm:$0x1]  ;;  %368 = vst [vmem:[#allocation2 + $0x44] sm:$0x1] %v367_v22  ;;  %v340_v26 = vsel %vm1709_vm4, %v315_v23, %v339_v25  ;;  %v319_v28 = vld [vmem:[%s1707_s21 + $0x24] sm:$0x1] }
  0x26   : > { %v321_v29 = vld [vmem:[%s1707_s21 + $0x2c] sm:$0x1]  ;;  %341 = vst [vmem:[#allocation2 + $0x14] sm:$0x1] %v340_v26  ;;  %v344_v30 = vsel %vm1709_vm4, %v317_v24, %v343_v27  ;;  %v323_v33 = vld [vmem:[%s1707_s21 + $0x34] sm:$0x1]  ;;  %v348_v34 = vsel %vm1709_vm4, %v319_v28, %v347_v31 }
  0x27   : > { %345 = vst [vmem:[#allocation2 + $0x1c] sm:$0x1] %v344_v30  ;;  %v352_v35 = vsel %vm1709_vm4, %v321_v29, %v351_v32  ;;  %v325_v36 = vld [vmem:[%s1707_s21 + $0x3c] sm:$0x1]  ;;  %v1481_v39 = vld [vmem:[#allocation2 + $0x8] ss:$8 sps:$4 sm:$0xff]   ;;  %v356_v40 = vsel %vm1709_vm4, %v323_v33, %v355_v37 }
  0x28   : > { %349 = vst [vmem:[#allocation2 + $0x24] sm:$0x1] %v348_v34  ;;  %353 = vst [vmem:[#allocation2 + $0x2c] sm:$0x1] %v352_v35  ;;  %v360_v41 = vsel %vm1709_vm4, %v325_v36, %v359_v38  ;;  %v1482_v42 = vld [vmem:[#allocation2 + $0x18] ss:$8 sps:$4 sm:$0xff]   ;;  %1374 = vmatprep.mubr.msk.bf16.mxu0 %vm523_vm3, %v1481_v39 }
  0x29   : > { %357 = vst [vmem:[#allocation2 + $0x34] sm:$0x1] %v356_v40  ;;  %361 = vst [vmem:[#allocation2 + $0x3c] sm:$0x1] %v360_v41  ;;  %v1484_v43 = vld [vmem:[#allocation2 + $0x28] ss:$8 sps:$4 sm:$0xff]   ;;  %1375 = vmatmul.mubr.msk.bf16.vlgmr.msra.gmra.mrb[0].mxu0 %vm523_vm3, %v1482_v42 }
  0x2a   : > { %v1763_v44 = vld [vmem:[#allocation2] sm:$0xf]  ;;  %v1765_v45 = vld [vmem:[#allocation2 + $0x8] sm:$0xf]  ;;  %v379_v46 = vld [vmem:[#allocation2 + $0x4] sm:$0x1]  ;;  %1378 = vmatprep.mubr.msk.bf16.mxu0 %vm523_vm3, %v1484_v43  ;;  %1383 = vmatpush3.bf16.msra.mxu0 %v1702_v3 }
  0x2b   : > { %v380_v47 = vld [vmem:[#allocation2 + $0xc] sm:$0x1]  ;;  %v391_v48 = vshrl.u32 %v1763_v44, 16  ;;  %v394_v49 = vshll.u32 %v1763_v44, 16  ;;  %v400_v50 = vshll.u32 %v379_v46, 16  ;;  %v405_v51 = vshrl.u32 %v1765_v45, 16 }
  0x2c   : > { %v408_v52 = vshll.u32 %v1765_v45, 16  ;;  %v414_v53 = vshll.u32 %v380_v47, 16  ;;  %v1486_v58 = vld [vmem:[#allocation2 + $0x38] ss:$8 sps:$4 sm:$0xff]   ;;  %v1773_v61 = vld [vmem:[#allocation2 + $0x10] sm:$0xf] }
  0x2d   : > { %v393_v54 = vrot.slane %v391_v48, 4  ;;  %v396_v55 = vrot.slane %v394_v49, 5  ;;  %v402_v56 = vrot.slane %v400_v50, 5  ;;  %v407_v57 = vrot.slane %v405_v51, 4  ;;  %v1775_v62 = vld [vmem:[#allocation2 + $0x18] sm:$0xf] }
  0x2e   : > { %v410_v59 = vrot.slane %v408_v52, 5  ;;  %v416_v60 = vrot.slane %v414_v53, 5  ;;  %v381_v0 = vld [vmem:[#allocation2 + $0x14] sm:$0x1]  ;;  %v382_v1 = vld [vmem:[#allocation2 + $0x1c] sm:$0x1] }
  0x2f   : > { %v397_v63 = vor.u32 %v396_v55, %v393_v54  ;;  %v419_v4 = vshrl.u32 %v1773_v61, 16  ;;  %v422_v3 = vshll.u32 %v1773_v61, 16  ;;  %v428_v7 = vshll.u32 %v381_v0, 16  ;;  %v827_v10 = vld [vmem:[#allocation2 + $0x8] sm:$0xf]  ;;  %s1127_s21 = scalar_lea.sflag [#allocation4], %s1858_s30 }
  0x30   : > { %v411_v6 = vor.u32 %v410_v59, %v407_v57  ;;  %v433_v8 = vshrl.u32 %v1775_v62, 16  ;;  %v436_v9 = vshll.u32 %v1775_v62, 16  ;;  %v442_v14 = vshll.u32 %v382_v1, 16  ;;  %v828_v15 = vld [vmem:[#allocation2 + $0xc] sm:$0x1]  ;;  %s1491_s22 = scalar_lea.vmem %s1895_s8, 16 }
  0x31   : > { %v398_v11 = vrot.slane %v397_v63, 4  ;;  %v421_v12 = vrot.slane %v419_v4, 4  ;;  %v424_v13 = vrot.slane %v422_v3, 5  ;;  %1379 = vmatmul.mubr.msk.bf16.gmra.mrb[4].mxu0 %vm523_vm3, %v1486_v58  ;;  %v430_v17 = vrot.slane %v428_v7, 5  ;;  %v829_v20 = vld [vmem:[#allocation2 + $0x10] sm:$0xf]  ;;  %p1492_p12 = scmp.ne.s32.totalorder %s1895_s8, %s1491_s22 }
  0x32   : > { %v412_v16 = vrot.slane %v411_v6, 4  ;;  %v435_v18 = vrot.slane %v433_v8, 4  ;;  %v438_v19 = vrot.slane %v436_v9, 5  ;;  %v444_v23 = vrot.slane %v442_v14, 5  ;;  %v830_v27 = vld [vmem:[#allocation2 + $0x14] sm:$0x1] }
  0x33   : > { %v403_v21 = vsel %vm1781_vm7, %v398_v11, %v402_v56  ;;  %v425_v22 = vor.u32 %v424_v13, %v421_v12  ;;  %v844_v24 = vshrl.u32 %v827_v10, 16  ;;  %v847_v28 = vshll.u32 %v827_v10, 16  ;;  %v1792_v30 = vld [vmem:[#allocation2 + $0x20] sm:$0xf]  ;;  %v383_v39 = vld [vmem:[#allocation2 + $0x24] sm:$0x1]  ;;  %p1493_p13 = pnand %p1492_p12, %p1671_p4 }
  0x34   : > { %v417_v25 = vsel %vm1781_vm7, %v412_v16, %v416_v60  ;;  %v439_v26 = vor.u32 %v438_v19, %v435_v18  ;;  %v853_v29 = vshll.u32 %v828_v15, 16  ;;  %v858_v34 = vshrl.u32 %v829_v20, 16  ;;  %v1797_v43 = vld [vmem:[#allocation2 + $0x28] sm:$0xf]  ;;  %v384_v50 = vld [vmem:[#allocation2 + $0x2c] sm:$0x1] }
  0x35   : > { %v1286_v31 = vcombine.low %v403_v21, %v417_v25  ;;  %v426_v32 = vrot.slane %v425_v22, 4  ;;  %v846_v33 = vrot.slane %v844_v24, 4  ;;  %v849_v36 = vrot.slane %v847_v28, 5  ;;  %v831_v52 = vld [vmem:[#allocation2 + $0x18] sm:$0xf]  ;;  %p1494_p0 = pneg %p1493_p13  ;;  %s1497_s29 = scalar_lea.vmem %s1496_s26, 32 }
  0x36   : > { %v440_v35 = vrot.slane %v439_v26, 4  ;;  %v855_v37 = vrot.slane %v853_v29, 5  ;;  %v861_v38 = vshll.u32 %v829_v20, 16  ;;  %v860_v41 = vrot.slane %v858_v34, 4  ;;  %v832_v63 = vld [vmem:[#allocation2 + $0x1c] sm:$0x1]  ;;  %p1499_p2 = scmp.lt.s32.totalorder %s1497_s29, %s1491_s22 }
  0x37   : > { %1354 = vmatprep.mubr.msk.bf16.mxu1 %vm523_vm3, %v1286_v31  ;;  %v431_v40 = vsel %vm1781_vm7, %v426_v32, %v430_v17  ;;  %v867_v42 = vshll.u32 %v830_v27, 16  ;;  %v447_v46 = vshrl.u32 %v1792_v30, 16  ;;  %v850_v48 = vor.u32 %v849_v36, %v846_v33  ;;  %v833_v3 = vld [vmem:[#allocation2 + $0x20] sm:$0xf]  ;;  %v834_v13 = vld [vmem:[#allocation2 + $0x24] sm:$0x1] }
  0x38   : > { %v445_v47 = vsel %vm1781_vm7, %v440_v35, %v444_v23  ;;  %v863_v49 = vrot.slane %v861_v38, 5  ;;  %v450_v51 = vshll.u32 %v1792_v30, 16  ;;  %v456_v56 = vshll.u32 %v383_v39, 16  ;;  %v1811_v20 = vld [vmem:[#allocation2 + $0x30] sm:$0xf]  ;;  %p1500_p3 = por %p1499_p2, %p1498_p1 }
  0x39   : > { %v1287_v53 = vcombine.low %v431_v40, %v445_v47  ;;  %v869_v54 = vrot.slane %v867_v42, 5  ;;  %v449_v55 = vrot.slane %v447_v46, 4  ;;  %v851_v57 = vrot.slane %v850_v48, 4  ;;  %v1813_v24 = vld [vmem:[#allocation2 + $0x38] sm:$0xf] }
  0x3a   : > { %v864_v58 = vor.u32 %v863_v49, %v860_v41  ;;  %v452_v59 = vrot.slane %v450_v51, 5  ;;  %v461_v60 = vshrl.u32 %v1797_v43, 16  ;;  %v458_v0 = vrot.slane %v456_v56, 5  ;;  %v385_v25 = vld [vmem:[#allocation2 + $0x34] sm:$0x1]  ;;  %p1501_p5 = pnand %p1500_p3, %p1494_p0 }
  0x3b   : > { %1355 = vmatmul.mubr.msk.bf16.vlgmr.msra.gmra.mrb[0].mxu1 %vm523_vm3, %v1287_v53  ;;  %v464_v1 = vshll.u32 %v1797_v43, 16  ;;  %v470_v4 = vshll.u32 %v384_v50, 16  ;;  %v872_v6 = vshrl.u32 %v831_v52, 16  ;;  %v856_v7 = vsel %vm1781_vm7, %v851_v57, %v855_v37  ;;  %v386_v36 = vld [vmem:[#allocation2 + $0x3c] sm:$0x1] }
  0x3c   : > { %1363 = vmatpush3.bf16.msra.mxu1 %v1697_v2  ;;  %v865_v8 = vrot.slane %v864_v58, 4  ;;  %v453_v9 = vor.u32 %v452_v59, %v449_v55  ;;  %v463_v10 = vrot.slane %v461_v60, 4  ;;  %v875_v15 = vshll.u32 %v831_v52, 16  ;;  %v835_v47 = vld [vmem:[#allocation2 + $0x28] sm:$0xf] }
  0x3d   : > { %v466_v11 = vrot.slane %v464_v1, 5  ;;  %v472_v12 = vrot.slane %v470_v4, 5  ;;  %v874_v14 = vrot.slane %v872_v6, 4  ;;  %v881_v18 = vshll.u32 %v832_v63, 16  ;;  %v836_v48 = vld [vmem:[#allocation2 + $0x2c] sm:$0x1] }
  0x3e   : > { %v870_v16 = vsel %vm1781_vm7, %v865_v8, %v869_v54  ;;  %v454_v17 = vrot.slane %v453_v9, 4  ;;  %v886_v19 = vshrl.u32 %v833_v3, 16  ;;  %v877_v22 = vrot.slane %v875_v15, 5  ;;  %v837_v52 = vld [vmem:[#allocation2 + $0x30] sm:$0xf] }
  0x3f   : > { %v1317_v2 = vcombine.low %v856_v7, %v870_v16  ;;  %v467_v21 = vor.u32 %v466_v11, %v463_v10  ;;  %v889_v23 = vshll.u32 %v833_v3, 16  ;;  %v883_v27 = vrot.slane %v881_v18, 5  ;;  %v838_v59 = vld [vmem:[#allocation2 + $0x34] sm:$0x1]  ;;  %v840_v10 = vld [vmem:[#allocation2 + $0x3c] sm:$0x1] }
  0x40   : > { %v459_v26 = vsel %vm1781_vm7, %v454_v17, %v458_v0  ;;  %v888_v28 = vrot.slane %v886_v19, 4  ;;  %v895_v29 = vshll.u32 %v834_v13, 16  ;;  %v878_v32 = vor.u32 %v877_v22, %v874_v14  ;;  %v841_v15 = vld [vmem:[#allocation2 + $0x40] sm:$0xf] }
  0x41   : > { %1384 = vmatprep.mubr.msk.bf16.mxu0 %vm523_vm3, %v1317_v2  ;;  %v468_v31 = vrot.slane %v467_v21, 4  ;;  %v891_v33 = vrot.slane %v889_v23, 5  ;;  %v475_v34 = vshrl.u32 %v1811_v20, 16  ;;  %v478_v37 = vshll.u32 %v1811_v20, 16 }
  0x42   : > { %v897_v35 = vrot.slane %v895_v29, 5  ;;  %v484_v38 = vshll.u32 %v385_v25, 16  ;;  %v489_v39 = vshrl.u32 %v1813_v24, 16  ;;  %v879_v41 = vrot.slane %v878_v32, 4 }
  0x43   : > { %v473_v40 = vsel %vm1781_vm7, %v468_v31, %v472_v12  ;;  %v892_v42 = vor.u32 %v891_v33, %v888_v28  ;;  %v477_v46 = vrot.slane %v475_v34, 4  ;;  %v480_v50 = vrot.slane %v478_v37, 5 }
  0x44   : > { %v1288_v49 = vcombine.low %v459_v26, %v473_v40  ;;  %v491_v51 = vrot.slane %v489_v39, 4  ;;  %v1295_v53 = vcombine.low %v1763_v44, %v1765_v45  ;;  %v884_v54 = vsel %vm1781_vm7, %v879_v41, %v883_v27  ;;  %v839_v45 = vld [vmem:[#allocation2 + $0x38] sm:$0xf]  ;;  %v842_v26 = vld [vmem:[#allocation2 + $0x44] sm:$0x1] }
  0x45   : > { %v893_v55 = vrot.slane %v892_v42, 4  ;;  %v492_v56 = vshll.u32 %v1813_v24, 16  ;;  %v498_v57 = vshll.u32 %v386_v36, 16  ;;  %v481_v58 = vor.u32 %v480_v50, %v477_v46 }
  0x46   : > { %1358 = vmatprep.mubr.msk.bf16.mxu1 %vm523_vm3, %v1288_v49  ;;  %v900_v60 = vshrl.u32 %v835_v47, 16  ;;  %v903_v63 = vshll.u32 %v835_v47, 16  ;;  %v909_v0 = vshll.u32 %v836_v48, 16  ;;  %v486_v4 = vrot.slane %v484_v38, 5 }
  0x47   : > { %v898_v1 = vsel %vm1781_vm7, %v893_v55, %v897_v35  ;;  %v494_v3 = vrot.slane %v492_v56, 5  ;;  %v914_v44 = vshrl.u32 %v837_v52, 16  ;;  %v482_v7 = vrot.slane %v481_v58, 4 }
  0x48   : > { %v1318_v6 = vcombine.low %v884_v54, %v898_v1  ;;  %v902_v8 = vrot.slane %v900_v60, 4  ;;  %v905_v9 = vrot.slane %v903_v63, 5  ;;  %v500_v12 = vrot.slane %v498_v57, 5 }
  0x49   : > { %v495_v11 = vor.u32 %v494_v3, %v491_v51  ;;  %v916_v13 = vrot.slane %v914_v44, 4  ;;  %v917_v14 = vshll.u32 %v837_v52, 16  ;;  %v911_v17 = vrot.slane %v909_v0, 5 }
  0x4a   : > { %1385 = vmatmul.mubr.msk.bf16.vlgmr.msra.gmra.mrb[0].mxu0 %vm523_vm3, %v1318_v6  ;;  %v906_v16 = vor.u32 %v905_v9, %v902_v8  ;;  %v923_v18 = vshll.u32 %v838_v59, 16  ;;  %v928_v19 = vshrl.u32 %v839_v45, 16  ;;  %v487_v2 = vsel %vm1781_vm7, %v482_v7, %v486_v4 }
  0x4b   : > { %v496_v21 = vrot.slane %v495_v11, 4  ;;  %v919_v22 = vrot.slane %v917_v14, 5  ;;  %v931_v23 = vshll.u32 %v839_v45, 16  ;;  %v937_v28 = vshll.u32 %v840_v10, 16 }
  0x4c   : > { %v907_v25 = vrot.slane %v906_v16, 4  ;;  %v930_v27 = vrot.slane %v928_v19, 4  ;;  %v942_v29 = vshrl.u32 %v841_v15, 16  ;;  %v925_v33 = vrot.slane %v923_v18, 5 }
  0x4d   : > { %v501_v31 = vsel %vm1781_vm7, %v496_v21, %v500_v12  ;;  %v920_v32 = vor.u32 %v919_v22, %v916_v13  ;;  %v933_v34 = vrot.slane %v931_v23, 5  ;;  %v945_v37 = vshll.u32 %v841_v15, 16 }
  0x4e   : > { %v1289_v35 = vcombine.low %v487_v2, %v501_v31  ;;  %v944_v36 = vrot.slane %v942_v29, 4  ;;  %v912_v38 = vsel %vm1781_vm7, %v907_v25, %v911_v17  ;;  %v951_v41 = vshll.u32 %v842_v26, 16 }
  0x4f   : > { %v921_v39 = vrot.slane %v920_v32, 4  ;;  %v934_v40 = vor.u32 %v933_v34, %v930_v27  ;;  %v939_v42 = vrot.slane %v937_v28, 5  ;;  %v947_v46 = vrot.slane %v945_v37, 5 }
  0x50   : > { %1359 = vmatmul.mubr.msk.bf16.gmra.mrb[4].mxu1 %vm523_vm3, %v1289_v35  ;;  %v953_v51 = vrot.slane %v951_v41, 5  ;;  %v1296_v55 = vcombine.low %v1773_v61, %v1775_v62  ;;  %v1297_v56 = vcombine.low %v1792_v30, %v1797_v43  ;;  %v1298_v58 = vcombine.low %v1811_v20, %v1813_v24 }
  0x51   : > { %v926_v47 = vsel %vm1781_vm7, %v921_v39, %v925_v33  ;;  %1364 = vmatprep.mubr.msk.bf16.mxu1 %vm523_vm3, %v1295_v53  ;;  %v935_v48 = vrot.slane %v934_v40, 4  ;;  %v948_v50 = vor.u32 %v947_v46, %v944_v36  ;;  %v1603_v61 = vmov 0.0  }
  0x52   : > { %v1319_v49 = vcombine.low %v912_v38, %v926_v47  ;;  %1066 = vst.msk [vmem:[%s1861_s5] sm:$0x1] %vm1065_vm8, %v1603_v61  ;;  %1067 = vst.msk [vmem:[%s1866_s6] sm:$0x1] %vm1065_vm8, %v1603_v61 }
  0x53   : > { %v940_v52 = vsel %vm1781_vm7, %v935_v48, %v939_v42  ;;  %v949_v54 = vrot.slane %v948_v50, 4 }
  0x54   : > { %1388 = vmatprep.mubr.msk.bf16.mxu0 %vm523_vm3, %v1319_v49 }
  0x55   : > { %v954_v53 = vsel %vm1781_vm7, %v949_v54, %v953_v51 }
  0x56   : > { %v1320_v57 = vcombine.low %v940_v52, %v954_v53 }
  0x58   : > { %1365 = vmatmul.mubr.msk.bf16.vlgmr.msra.gmra.mrb[0].mxu1 %vm523_vm3, %v1296_v55  ;;  %1389 = vmatmul.mubr.msk.bf16.gmra.mrb[4].mxu0 %vm523_vm3, %v1320_v57 }
  0x59   : > { %1368 = vmatprep.mubr.msk.bf16.mxu1 %vm523_vm3, %v1297_v56 }
  0x60   : > { %1369 = vmatmul.mubr.msk.bf16.gmra.mrb[4].mxu1 %vm523_vm3, %v1298_v58 }
 0x11d   : > { %v1386_v62 = vpop.f32.mrb[0].mxu0 }
 0x11e   : > { %v1022_v5 = vpop.f32.mrb[1].mxu0 }
 0x11f   : > { %v1387_v30 = vpop.f32.mrb[2].mxu0 }
 0x120   : > { %v1025_v43 = vpop.f32.mrb[3].mxu0 }
 0x12b   : > { %v1366_v20 = vpop.f32.mrb[0].mxu1  ;;  %v1390_v24 = vpop.f32.mrb[4].mxu0 }
 0x12c   : > { %v1392_v59 = vadd.f32 %v1386_v62, %v1366_v20  ;;  %v673_v60 = vpop.f32.mrb[1].mxu1  ;;  %v1038_v63 = vpop.f32.mrb[5].mxu0 }
 0x12d   : > { %v1393_v0 = vadd.f32 %v1022_v5, %v673_v60  ;;  %v1367_v1 = vpop.f32.mrb[2].mxu1  ;;  %v1391_v4 = vpop.f32.mrb[6].mxu0  ;;  %v1068_v60 = vld [vmem:[%s1861_s5] sm:$0x1] }
 0x12e   : > { %v1394_v3 = vadd.f32 %v1387_v30, %v1367_v1  ;;  %v676_v44 = vpop.f32.mrb[3].mxu1  ;;  %v1041_v6 = vpop.f32.mrb[7].mxu0  ;;  %v1097_v8 = vmul.f32 %v1392_v59, %v1392_v59  ;;  %v1073_v14 = vsel %vm1069_vm9, %v1392_v59, 0.0 }
 0x12f   : > { %v1095_v45 = vmul.f32 %v1393_v0, %v1393_v0  ;;  %v1395_v7 = vadd.f32 %v1025_v43, %v676_v44  ;;  %v1070_v9 = vsel %vm1069_vm9, %v1393_v0, 0.0 }
 0x130   : > { %v1098_v12 = vmul.f32 %v1394_v3, %v1394_v3  ;;  %v1106_v22 = vsel %vm1069_vm9, %v1097_v8, 0.0  ;;  %v1075_v23 = vsel %vm1069_vm9, %v1394_v3, 0.0 }
 0x131   : > { %v1071_v10 = vsel %vm1069_vm9, %v1395_v7, 0.0  ;;  %v1096_v11 = vmul.f32 %v1395_v7, %v1395_v7  ;;  %v1103_v15 = vsel %vm1069_vm9, %v1095_v45, 0.0 }
 0x132   : > { %v1072_v13 = vadd.f32 %v1071_v10, %v1070_v9  ;;  %v1108_v27 = vsel %vm1069_vm9, %v1098_v12, 0.0 }
 0x133   : > { %v1104_v16 = vsel %vm1069_vm9, %v1096_v11, 0.0  ;;  %v1370_v17 = vpop.f32.mrb[4].mxu1 }
 0x134   : > { %v1074_v18 = vadd.f32 %v1073_v14, %v1072_v13  ;;  %v1105_v19 = vadd.f32 %v1104_v16, %v1103_v15  ;;  %v1396_v2 = vadd.f32 %v1390_v24, %v1370_v17  ;;  %v689_v21 = vpop.f32.mrb[5].mxu1 }
 0x135   : > { %v1397_v25 = vadd.f32 %v1038_v63, %v689_v21  ;;  %v1371_v26 = vpop.f32.mrb[6].mxu1 }
 0x136   : > { %v1107_v28 = vadd.f32 %v1106_v22, %v1105_v19  ;;  %v1076_v29 = vadd.f32 %v1075_v23, %v1074_v18  ;;  %v692_v31 = vpop.f32.mrb[7].mxu1  ;;  %v1398_v34 = vadd.f32 %v1391_v4, %v1371_v26  ;;  %v1101_v40 = vmul.f32 %v1396_v2, %v1396_v2  ;;  %v1094_v4 = vld [vmem:[%s1866_s6] sm:$0x1] }
 0x137   : > { %v1077_v32 = vsel %vm1069_vm9, %v1397_v25, 0.0  ;;  %v1099_v33 = vmul.f32 %v1397_v25, %v1397_v25  ;;  %v1399_v35 = vadd.f32 %v1041_v6, %v692_v31  ;;  %v1081_v47 = vsel %vm1069_vm9, %v1396_v2, 0.0 }
 0x138   : > { %v1078_v36 = vadd.f32 %v1077_v32, %v1076_v29  ;;  %v1109_v37 = vadd.f32 %v1108_v27, %v1107_v28  ;;  %v1102_v48 = vmul.f32 %v1398_v34, %v1398_v34  ;;  %v1083_v51 = vsel %vm1069_vm9, %v1398_v34, 0.0 }
 0x139   : > { %v1110_v38 = vsel %vm1069_vm9, %v1099_v33, 0.0  ;;  %v1079_v39 = vsel %vm1069_vm9, %v1399_v35, 0.0  ;;  %v1100_v46 = vmul.f32 %v1399_v35, %v1399_v35  ;;  %v1114_v54 = vsel %vm1069_vm9, %v1101_v40, 0.0 }
 0x13a   : > { %v1111_v41 = vadd.f32 %v1110_v38, %v1109_v37  ;;  %v1080_v42 = vadd.f32 %v1079_v39, %v1078_v36  ;;  %v1116_v53 = vsel %vm1069_vm9, %v1102_v48, 0.0 }
 0x13b   : > { %v1112_v50 = vsel %vm1069_vm9, %v1100_v46, 0.0 }
 0x13c   : > { %v1082_v49 = vadd.f32 %v1081_v47, %v1080_v42  ;;  %v1113_v52 = vadd.f32 %v1112_v50, %v1111_v41 }
 0x13e   : > { %v1084_v55 = vadd.f32 %v1083_v51, %v1082_v49  ;;  %v1115_v56 = vadd.f32 %v1114_v54, %v1113_v52 }
 0x140   : > { %v1085_v57 = vrot.slane %v1084_v55, 4  ;;  %v1117_v58 = vadd.f32 %v1116_v53, %v1115_v56 }
 0x142   : > { %v1086_v61 = vadd.f32 %v1085_v57, %v1084_v55  ;;  %v1118_v62 = vrot.slane %v1117_v58, 4 }
 0x144   : > { %v1087_v5 = vrot.slane %v1086_v61, 2  ;;  %v1119_v30 = vadd.f32 %v1118_v62, %v1117_v58 }
 0x146   : > { %v1088_v43 = vadd.f32 %v1087_v5, %v1086_v61  ;;  %v1120_v20 = vrot.slane %v1119_v30, 2 }
 0x148   : > { %v1089_v24 = vrot.slane %v1088_v43, 1  ;;  %v1121_v59 = vadd.f32 %v1120_v20, %v1119_v30 }
 0x14a   : > { %v1090_v63 = vadd.f32 %v1089_v24, %v1088_v43  ;;  %v1122_v0 = vrot.slane %v1121_v59, 1 }
 0x14c   : > { %v1091_v1 = vadd.f32 %v1090_v63, %v1068_v60  ;;  %v1123_v3 = vadd.f32 %v1122_v0, %v1121_v59 }
 0x14e   : > { %1093 = vst.msk [vmem:[%s1861_s5] sm:$0x1] %vm1065_vm8, %v1091_v1 }
 0x14f   : > { %1504 = shalt.err (!%p1501_p5)
}
 0x150   : > { %s1505_s5 = scalar_lea.hbm %s1893_s12, 16  ;;  %s1509_s11 = scalar_lea.hbm %s1978_s3, 32 }
 0x151   : > { %p1506_p6 = scmp.ne.s32.totalorder %s1893_s12, %s1505_s5  ;;  %p1510_p10 = scmp.lt.u32.totalorder %s1893_s12, %s1978_s3 }
 0x152   : > { %p1511_p11 = scmp.lt.u32.totalorder %s1509_s11, %s1505_s5  ;;  %p1513_p13 = scmp.lt.u32.totalorder %s1505_s5, %s1893_s12 }
 0x153   : > { %p1507_p7 = pnand %p1506_p6, %p1671_p4 }
 0x154   : > { %p1512_p12 = por %p1511_p11, %p1510_p10 }
 0x155   : > { %p1508_p9 = pneg %p1507_p7 }
 0x156   : > { %p1514_p0 = por %p1513_p13, %p1512_p12 }
 0x158   : > { %p1515_p1 = pnand %p1514_p0, %p1508_p9 }
 0x15a   : > { %1518 = shalt.err (!%p1515_p1)
}
 0x15b   : > { %1418 = dma.vmem_to_hbm [thread:$0]  (%p1671_p4), %s1895_s8, 16, %s1893_s12, %s1127_s21   ;;  %v1124_v44 = vadd.f32 %v1123_v3, %v1094_v4 }
 0x15c   : > { %s1131_s22 = scalar_lea.sflag [#allocation6], %s1858_s30  ;;  %s1519_s24 = scalar_lea.vmem %s1905_s9, 16 }
 0x15d   : > { %1125 = vst.msk [vmem:[%s1866_s6] sm:$0x1] %vm1065_vm8, %v1124_v44  ;;  %p1520_p2 = scmp.ne.s32.totalorder %s1905_s9, %s1519_s24  ;;  %s1605_s26 = smov [#allocation5]  }
 0x15e   : > { %s1523_s29 = sshll.u32 %s1605_s26, 4  ;;  %s1524_s29 = int_to_ptr.vmem [resolvable:$false] %s1523_s29 }
 0x15f   : > { %p1521_p3 = pnand %p1520_p2, %p1671_p4  ;;  %s1525_s5 = scalar_lea.vmem %s1524_s29, 32 }
 0x160   : > { %p1526_p6 = scmp.lt.s32.totalorder %s1905_s9, %s1524_s29  ;;  %p1527_p7 = scmp.lt.s32.totalorder %s1525_s5, %s1519_s24 }
 0x161   : > { %p1522_p5 = pneg %p1521_p3 }
 0x162   : > { %p1528_p9 = por %p1527_p7, %p1526_p6 }
 0x164   : > { %p1529_p10 = pnand %p1528_p9, %p1522_p5 }
 0x166   : > { %1532 = shalt.err (!%p1529_p10)
}
 0x167   : > { %s1533_s30 = scalar_lea.hbm %s1903_s14, 16  ;;  %s1537_s12 = scalar_lea.hbm %s1979_s4, 32 }
 0x168   : > { %p1534_p11 = scmp.ne.s32.totalorder %s1903_s14, %s1533_s30  ;;  %p1538_p0 = scmp.lt.u32.totalorder %s1903_s14, %s1979_s4 }
 0x169   : > { %p1539_p1 = scmp.lt.u32.totalorder %s1537_s12, %s1533_s30  ;;  %p1541_p3 = scmp.lt.u32.totalorder %s1533_s30, %s1903_s14 }
 0x16a   : > { %p1535_p12 = pnand %p1534_p11, %p1671_p4 }
 0x16b   : > { %p1540_p2 = por %p1539_p1, %p1538_p0 }
 0x16c   : > { %p1536_p13 = pneg %p1535_p12 }
 0x16d   : > { %p1542_p5 = por %p1541_p3, %p1540_p2 }
 0x16f   : > { %p1543_p6 = pnand %p1542_p5, %p1536_p13 }
 0x171   : > { %1546 = shalt.err (!%p1543_p6)
}
 0x172   : > { %1419 = dma.vmem_to_hbm [thread:$0]  (%p1671_p4), %s1905_s9, 16, %s1903_s14, %s1131_s22  }
 0x173 PF: > { %p1430_p7 = scmp.ge.s32.totalorder %s1601_s20, 2  ;;  %s1168_s10 = sand.u32 1, %s1581_s15  }
 0x174   : > { %s1169_s11 = scalar_lea.sflag [#allocation4], %s1168_s10 }
 0x175   : > { %p1423_p9 = pnand %p1430_p7, %p1678_p8 }
 0x177   : > { %1572 = dma.done.wait (!%p1423_p9), %s1169_s11, 16  }
 0x178   : > { %1574 = vsyncadd (!%p1423_p9), %s1169_s11, 4294967280  ;;  %s1177_s18 = scalar_lea.sflag [#allocation6], %s1168_s10 }
 0x179   : > { %1576 = dma.done.wait (!%p1423_p9), %s1177_s18, 16  }
 0x17a   : > { %1578 = vsyncadd (!%p1423_p9), %s1177_s18, 4294967280  ;;  %s21_s20 = sadd.s32 1, %s1601_s20   ;;  %s1986_s15 = smov %s1585_s16 }
 0x17b   : > { %p18_p10 = scmp.ge.s32.totalorder %s21_s20, 4   ;;  %s1987_s16 = smov %s1589_s17 }
 0x17c   : > { %s1988_s17 = smov %s1684_s28  ;;  %s1989_s18 = smov %s1597_s19 }
 0x17d   : > { %s1990_s19 = smov %s1992_s23  ;;  %20 = sbr.rel (!%p18_p10) target bundleno = 6 (0x6), region = 96 }
 0x184   :  { %1181 = vsyncpa [#allocation4], 1 }
 0x185   :  { %1183 = vsyncpa [#allocation4 + $0x1], 1 }
 0x186   :  { %1184 = vsyncpa [#allocation6], 1 }
 0x187   :  { %1186 = vsyncpa [#allocation6 + $0x1], 1 }

</bundles_post_ra>
